<compile_context>
chip_gen: v7x
topology: tpu7x:2x2x1
jax: 0.10.0
libtpu: 0.0.40
codegen_flags: <defaults>
</compile_context>

<pallas_src>
import functools

import jax
import jax.numpy as jnp
from jax import lax
from jax.experimental import pallas as pl
from jax.experimental.pallas import tpu as pltpu

# ------------------------------ configuration (small) -------------------------------
IMG = 16          # img_size
PATCH = 4         # patch_size
IN_CHANS = 4      # in_chans
EMBED_DIM = 96    # embed_dim (PyTorch default)
BATCH = 2
LN_EPS = 1e-5     # PyTorch nn.LayerNorm default eps


# --------------------------------- Pallas kernels ------------------------------------
def _proj_kernel(x_ref, w_ref, b_ref, o_ref):
    # patch projection: (tm, K) @ (K, N) + bias  — norm_layer is None path.
    y = jnp.dot(x_ref[...], w_ref[...], preferred_element_type=jnp.float32)
    y = y + b_ref[...]
    o_ref[...] = y.astype(o_ref.dtype)


def _proj_norm_kernel(x_ref, w_ref, b_ref, g_ref, beta_ref, o_ref):
    # fused: patch projection + bias + LayerNorm(embed_dim), all VMEM-resident.
    y = jnp.dot(x_ref[...], w_ref[...], preferred_element_type=jnp.float32)
    y = y + b_ref[...]
    mean = jnp.mean(y, axis=-1, keepdims=True)
    yc = y - mean
    var = jnp.mean(yc * yc, axis=-1, keepdims=True)
    y = yc * lax.rsqrt(var + LN_EPS) * g_ref[...] + beta_ref[...]
    o_ref[...] = y.astype(o_ref.dtype)


# ------------------------------------ wrapper -----------------------------------------
def patch_embed(x_nchw, params):
    """x_nchw: (B, C, H, W) float32 -> (B, L, embed_dim); matches PatchEmbed.forward."""
    B, C, H, W = x_nchw.shape
    assert H == IMG and W == IMG, (
        f"Input image size ({H}*{W}) doesn't match model ({IMG}*{IMG}).")
    p = PATCH
    Hp, Wp = H // p, W // p
    L = Hp * Wp
    K = C * p * p
    M = B * L
    N = EMBED_DIM

    # Non-overlapping-patch "im2col": pure layout transform (no duplication, no extra
    # HBM traffic beyond reading the input once). Row order (b, i, j); column order
    # (c, dy, dx) to match PyTorch Conv2d weight layout (O, I, kh, kw).
    patches = (x_nchw.reshape(B, C, Hp, p, Wp, p)
               .transpose(0, 2, 4, 1, 3, 5)
               .reshape(M, K))

    w2d = params["proj_w"].reshape(N, K).T            # (K, N)
    b2d = params["proj_b"].reshape(1, N)
    use_norm = "norm_g" in params

    # One big row-block per grid step; keep a 2-way parallel leading axis so both
    # TensorCores on v7x get work (don't collapse to grid=(1,)).  Fall back to a
    # single full-M block only when 2 blocks would violate the sublane multiple.
    nblk = 2 if (M % 2 == 0 and (M // 2) % 8 == 0) else 1
    tm = M // nblk

    args = [patches, w2d, b2d]
    in_specs = [
        pl.BlockSpec((tm, K), lambda i: (i, 0)),
        pl.BlockSpec((K, N), lambda i: (0, 0)),
        pl.BlockSpec((1, N), lambda i: (0, 0)),
    ]
    if use_norm:
        kernel = _proj_norm_kernel
        args += [params["norm_g"].reshape(1, N), params["norm_b"].reshape(1, N)]
        in_specs += [
            pl.BlockSpec((1, N), lambda i: (0, 0)),
            pl.BlockSpec((1, N), lambda i: (0, 0)),
        ]
    else:
        kernel = _proj_kernel

    out = pl.pallas_call(
        kernel,
        out_shape=jax.ShapeDtypeStruct((M, N), x_nchw.dtype),
        grid=(nblk,),
        in_specs=in_specs,
        out_specs=pl.BlockSpec((tm, N), lambda i: (i, 0)),
        compiler_params=pltpu.CompilerParams(dimension_semantics=("parallel",)),
    )(*args)
    return out.reshape(B, L, N)


# ------------------------------ pure-JAX reference ------------------------------------
def patch_embed_ref(x_nchw, params, use_norm):
    """Independent reference: real strided conv + flatten/transpose + LayerNorm."""
    y = lax.conv_general_dilated(
        x_nchw, params["proj_w"],
        window_strides=(PATCH, PATCH), padding="VALID",
        dimension_numbers=("NCHW", "OIHW", "NCHW"),
        precision=lax.Precision.HIGHEST)
    y = y + params["proj_b"].reshape(1, EMBED_DIM, 1, 1)
    B = x_nchw.shape[0]
    y = y.reshape(B, EMBED_DIM, -1).transpose(0, 2, 1)        # flatten(2).transpose(1,2)
    if use_norm:
        mean = jnp.mean(y, axis=-1, keepdims=True)
        var = jnp.mean((y - mean) ** 2, axis=-1, keepdims=True)
        y = (y - mean) / jnp.sqrt(var + LN_EPS) * params["norm_g"] + params["norm_b"]
    return y


# --------------------------- deterministic parameter setup ----------------------------
def init_params(key, with_norm):
    k1, k2, k3, k4 = jax.random.split(key, 4)
    p = {
        # PyTorch Conv2d layout: (out_channels, in_channels, kh, kw)
        "proj_w": 0.05 * jax.random.normal(k1, (EMBED_DIM, IN_CHANS, PATCH, PATCH),
                                           jnp.float32),
        "proj_b": 0.01 * jax.random.normal(k2, (EMBED_DIM,), jnp.float32),
    }
    if with_norm:
        # perturbed affine params so the test exercises the gamma/beta wiring
        p["norm_g"] = 1.0 + 0.05 * jax.random.normal(k3, (EMBED_DIM,), jnp.float32)
        p["norm_b"] = 0.05 * jax.random.normal(k4, (EMBED_DIM,), jnp.float32)
    return p


# --------------------------------------- main -----------------------------------------
if __name__ == "__main__":
    key = jax.random.PRNGKey(0)
    pkey, xkey = jax.random.split(key)
    x = jax.random.normal(xkey, (BATCH, IN_CHANS, IMG, IMG), jnp.float32)   # NCHW

    fwd = jax.jit(patch_embed)
    L = (IMG // PATCH) * (IMG // PATCH)

    # Path 1: norm_layer = nn.LayerNorm (fused projection + LN in one pallas_call)
    params_n = init_params(pkey, with_norm=True)
    out_n = jax.block_until_ready(fwd(x, params_n))
    ref_n = patch_embed_ref(x, params_n, use_norm=True)
    assert out_n.shape == (BATCH, L, EMBED_DIM), out_n.shape
    assert out_n.dtype == jnp.float32
    assert bool(jnp.all(jnp.isfinite(out_n)))
    assert bool(jnp.allclose(out_n, ref_n, atol=1e-4, rtol=1e-4)), \
        float(jnp.max(jnp.abs(out_n - ref_n)))

    # Path 2: norm_layer = None (module default): projection + bias only
    params_0 = init_params(pkey, with_norm=False)
    out_0 = jax.block_until_ready(fwd(x, params_0))
    ref_0 = patch_embed_ref(x, params_0, use_norm=False)
    assert out_0.shape == (BATCH, L, EMBED_DIM), out_0.shape
    assert bool(jnp.allclose(out_0, ref_0, atol=1e-4, rtol=1e-4)), \
        float(jnp.max(jnp.abs(out_0 - ref_0)))

    print("KERNEL_OK")
</pallas_src>

<mosaic_0001>
module attributes {stable_mosaic.version = 11 : i64} {
  func.func @_proj_norm_kernel(%arg0: i32, %arg1: memref<16x64xf32, #tpu.memory_space<vmem>>, %arg2: memref<64x96xf32, #tpu.memory_space<vmem>>, %arg3: memref<1x96xf32, #tpu.memory_space<vmem>>, %arg4: memref<1x96xf32, #tpu.memory_space<vmem>>, %arg5: memref<1x96xf32, #tpu.memory_space<vmem>>, %arg6: memref<16x96xf32, #tpu.memory_space<vmem>>) attributes {dimension_semantics = [#tpu.dimension_semantics<parallel>], iteration_bounds = array<i64: 2>, scalar_prefetch = 0 : i64, scratch_operands = 0 : i64, tpu.core_type = #tpu.core_type<tc>, window_params = [{transform_indices = @transform_0, window_bounds = array<i64: 16, 64>}, {pipeline_mode = #tpu.pipeline_mode<synchronous>, transform_indices = @transform_1, window_bounds = array<i64: 64, 96>}, {pipeline_mode = #tpu.pipeline_mode<synchronous>, transform_indices = @transform_2, window_bounds = array<i64: 1, 96>}, {pipeline_mode = #tpu.pipeline_mode<synchronous>, transform_indices = @transform_3, window_bounds = array<i64: 1, 96>}, {pipeline_mode = #tpu.pipeline_mode<synchronous>, transform_indices = @transform_4, window_bounds = array<i64: 1, 96>}, {transform_indices = @transform_5, window_bounds = array<i64: 16, 96>}]} {
    %c0 = arith.constant 0 : index
    %c0_0 = arith.constant 0 : index
    %0 = vector.load %arg1[%c0, %c0_0] : memref<16x64xf32, #tpu.memory_space<vmem>>, vector<16x64xf32>
    %c0_1 = arith.constant 0 : index
    %c0_2 = arith.constant 0 : index
    %1 = vector.load %arg2[%c0_1, %c0_2] : memref<64x96xf32, #tpu.memory_space<vmem>>, vector<64x96xf32>
    %cst = arith.constant dense<0.000000e+00> : vector<16x96xf32>
    %2 = tpu.matmul %0, %1, %cst {dimension_numbers = #tpu.dot_dimension_numbers<[1], [0], [0], [1], [0, 0, 1, 1], [], []>} : vector<16x64xf32>, vector<64x96xf32>, vector<16x96xf32> -> vector<16x96xf32>
    %c0_3 = arith.constant 0 : index
    %c0_4 = arith.constant 0 : index
    %3 = vector.load %arg3[%c0_3, %c0_4] : memref<1x96xf32, #tpu.memory_space<vmem>>, vector<1x96xf32>
    %4 = vector.broadcast %3 : vector<1x96xf32> to vector<16x96xf32>
    %5 = arith.addf %2, %4 : vector<16x96xf32>
    %cst_5 = arith.constant dense<0.000000e+00> : vector<16xf32>
    %6 = vector.multi_reduction <add>, %5, %cst_5 [1] : vector<16x96xf32> to vector<16xf32>
    %7 = vector.shape_cast %6 : vector<16xf32> to vector<16x1xf32>
    %cst_6 = arith.constant 9.600000e+01 : f32
    %8 = vector.broadcast %cst_6 : f32 to vector<16x1xf32>
    %9 = arith.divf %7, %8 : vector<16x1xf32>
    %10 = vector.broadcast %9 : vector<16x1xf32> to vector<16x96xf32>
    %11 = arith.subf %5, %10 : vector<16x96xf32>
    %12 = arith.mulf %11, %11 : vector<16x96xf32>
    %cst_7 = arith.constant dense<0.000000e+00> : vector<16xf32>
    %13 = vector.multi_reduction <add>, %12, %cst_7 [1] : vector<16x96xf32> to vector<16xf32>
    %14 = vector.shape_cast %13 : vector<16xf32> to vector<16x1xf32>
    %cst_8 = arith.constant 9.600000e+01 : f32
    %15 = vector.broadcast %cst_8 : f32 to vector<16x1xf32>
    %16 = arith.divf %14, %15 : vector<16x1xf32>
    %cst_9 = arith.constant 9.99999974E-6 : f32
    %17 = vector.broadcast %cst_9 : f32 to vector<16x1xf32>
    %18 = arith.addf %16, %17 : vector<16x1xf32>
    %19 = math.rsqrt %18 : vector<16x1xf32>
    %20 = vector.broadcast %19 : vector<16x1xf32> to vector<16x96xf32>
    %21 = arith.mulf %11, %20 : vector<16x96xf32>
    %c0_10 = arith.constant 0 : index
    %c0_11 = arith.constant 0 : index
    %22 = vector.load %arg4[%c0_10, %c0_11] : memref<1x96xf32, #tpu.memory_space<vmem>>, vector<1x96xf32>
    %23 = vector.broadcast %22 : vector<1x96xf32> to vector<16x96xf32>
    %24 = arith.mulf %21, %23 : vector<16x96xf32>
    %c0_12 = arith.constant 0 : index
    %c0_13 = arith.constant 0 : index
    %25 = vector.load %arg5[%c0_12, %c0_13] : memref<1x96xf32, #tpu.memory_space<vmem>>, vector<1x96xf32>
    %26 = vector.broadcast %25 : vector<1x96xf32> to vector<16x96xf32>
    %27 = arith.addf %24, %26 : vector<16x96xf32>
    %c0_14 = arith.constant 0 : index
    %c0_15 = arith.constant 0 : index
    %28 = vector.load %arg6[%c0_14, %c0_15] : memref<16x96xf32, #tpu.memory_space<vmem>>, vector<16x96xf32>
    tpu.vector_store %arg6[%c0_14, %c0_15], %27 {strides = array<i32>} : memref<16x96xf32, #tpu.memory_space<vmem>>, vector<16x96xf32>,
    return
  }
  func.func @transform_0(%arg0: i32) -> (i32, i32) {
    %c0_i32 = arith.constant 0 : i32
    %c0_i32_0 = arith.constant 0 : i32
    return %arg0, %c0_i32 : i32, i32
  }
  func.func @transform_1(%arg0: i32) -> (i32, i32) {
    %c0_i32 = arith.constant 0 : i32
    %c0_i32_0 = arith.constant 0 : i32
    %c0_i32_1 = arith.constant 0 : i32
    return %c0_i32, %c0_i32_0 : i32, i32
  }
  func.func @transform_2(%arg0: i32) -> (i32, i32) {
    %c0_i32 = arith.constant 0 : i32
    %c0_i32_0 = arith.constant 0 : i32
    %c0_i32_1 = arith.constant 0 : i32
    return %c0_i32, %c0_i32_0 : i32, i32
  }
  func.func @transform_3(%arg0: i32) -> (i32, i32) {
    %c0_i32 = arith.constant 0 : i32
    %c0_i32_0 = arith.constant 0 : i32
    %c0_i32_1 = arith.constant 0 : i32
    return %c0_i32, %c0_i32_0 : i32, i32
  }
  func.func @transform_4(%arg0: i32) -> (i32, i32) {
    %c0_i32 = arith.constant 0 : i32
    %c0_i32_0 = arith.constant 0 : i32
    %c0_i32_1 = arith.constant 0 : i32
    return %c0_i32, %c0_i32_0 : i32, i32
  }
  func.func @transform_5(%arg0: i32) -> (i32, i32) {
    %c0_i32 = arith.constant 0 : i32
    %c0_i32_0 = arith.constant 0 : i32
    return %arg0, %c0_i32 : i32, i32
  }
}

</mosaic_0001>

<bundles_post_ra>
// kernel: patch_embed.1
= control target key start
LH: loop header
LB: loop body
LE: loop exit
PB: predicated region body
PF: predicated region fallthrough
CT: control target
= control target key end

     0   :  { %10 = vsyncpa [#allocation3], 0  ;;  %s795_s0 = inlined_call_operand.vmem [shape: f32[32,64], index: 0, kind: input, shape index: {}]   ;;  %s796_s1 = inlined_call_operand.vmem [shape: f32[64,96], index: 1, kind: input, shape index: {}]   ;;  %s797_s2 = inlined_call_operand.vmem [shape: f32[1,96], index: 2, kind: input, shape index: {}]   ;;  %s798_s3 = inlined_call_operand.vmem [shape: f32[1,96], index: 3, kind: input, shape index: {}]   ;;  %s799_s4 = inlined_call_operand.vmem [shape: f32[1,96], index: 4, kind: input, shape index: {}]   ;;  %s800_s5 = inlined_call_operand.hbm [shape: f32[32,96], index: 5, kind: output, shape index: {}]  }
   0x1   :  { %12 = vsyncpa [#allocation3 + $0x1], 0  ;;  %s654_s18 = smov 0   ;;  %s656_s19 = smov 0  }
   0x2   :  { %s658_s20 = smov 0   ;;  %s660_s21 = smov 0  }
   0x3 LB: > { %s675_s22 = sadd.s32 4294967295, %s619_s21   ;;  %s449_s23 = sadd.s32 4294967294, %s619_s21   ;;  %s619_s21 = sphi %s660_s21, %s806_s21   ;;  %s615_s20 = sphi %s658_s20, %s805_s20   ;;  %s611_s19 = sphi %s656_s19, %s804_s19   ;;  %s607_s18 = sphi %s654_s18, %s803_s18  }
   0x4   : > { %s679_s24 = sadd.s32 1, %s619_s21   ;;  %s135_s25 = sadd.s32 1, %s615_s20 }
   0x5   : > { %s132_s26 = ssub.s32 %s619_s21, %s679_s24  ;;  %p145_p0 = scmp.ne.s32.totalorder %s615_s20, %s611_s19 }
   0x6   : > { %p133_p1 = scmp.eq.s32.totalorder %s132_s26, 0  ;;  %p146_p2 = scmp.eq.s32.totalorder %s675_s22, 1 }
   0x7   : > { %p151_p3 = scmp.ne.s32.totalorder %s611_s19, %s607_s18  ;;  %p152_p4 = scmp.eq.s32.totalorder %s449_s23, 1 }
   0x8   : > { %s690_s27 = scalar_select %p133_p1, %s615_s20, %s135_s25  }
   0x9   : > { %p692_p5 = por %p146_p2, %p145_p0  ;;  %p696_p6 = por %p152_p4, %p151_p3 }
   0xa   : > { %p452_p7 = scmp.ge.s32.totalorder %s619_s21, 1  ;;  %p191_p8 = scmp.lt.s32.totalorder %s619_s21, 3 }
   0xc   : > { %p192_p9 = pnand %p452_p7, %p191_p8 }
   0xd   : > { %v228_v0 = vld [vmem:[%s796_s1] sm:$0xff] (!%p192_p9)  ;;  %v229_v1 = vld [vmem:[%s796_s1 + $0x8] sm:$0xff] (!%p192_p9)  ;;  %v230_v2 = vld [vmem:[%s796_s1 + $0x10] sm:$0xff] (!%p192_p9)  ;;  %s454_s11 = sshll.u32 (!%p192_p9), %s675_s22, 1  ;;  %vm243_vm0 = vcmask (!%p192_p9), 523264   ;;  %vm325_vm1 = vcmask (!%p192_p9), 785408  }
   0xe   : > { %195 = sbr.rel (%p192_p9) target bundleno = 579 (0x243), region = 40  ;;  %v496_v3 = vpack.c.bf16 (!%p192_p9), %v229_v1, %v228_v0  ;;  %v231_v4 = vld [vmem:[%s796_s1 + $0x18] sm:$0xff] (!%p192_p9)  ;;  %p220_p10 = scmp.lt.s32.totalorder (!%p192_p9), %s454_s11, 3  ;;  %v232_v6 = vld [vmem:[%s796_s1 + $0x20] sm:$0xff] (!%p192_p9)  ;;  %v233_v7 = vld [vmem:[%s796_s1 + $0x28] sm:$0xff] (!%p192_p9) }
   0xf   : > { %v500_v5 = vpack.c.bf16 (!%p192_p9), %v231_v4, %v230_v2  ;;  %v504_v8 = vpack.c.bf16 (!%p192_p9), %v233_v7, %v232_v6  ;;  %v234_v9 = vld [vmem:[%s796_s1 + $0x30] sm:$0xff] (!%p192_p9)  ;;  %v235_v10 = vld [vmem:[%s796_s1 + $0x38] sm:$0xff] (!%p192_p9)  ;;  %v456_v14 = vld [vmem:[%s797_s2] ss:$0 sm:$0xff] (!%p192_p9)  ;;  %s216_s12 = sand.u32 (!%p192_p9), 1, %s611_s19  }
  0x10   : > { %497 = vmatprep.subr.bf16.mxu0 (!%p192_p9), %v496_v3  ;;  %v508_v12 = vpack.c.bf16 (!%p192_p9), %v235_v10, %v234_v9  ;;  %v459_v38 = vld [vmem:[%s798_s3] ss:$0 sm:$0xff] (!%p192_p9)  ;;  %s453_s15 = sshll.u32 (!%p192_p9), %s216_s12, 4  ;;  %s754_s8 = scalar_lea.sflag (!%p192_p9), [#allocation3], %s216_s12 }
  0x11   : > { %499 = vmatpush3.bf16.msra.mxu0 (!%p192_p9), %v496_v3  ;;  %v460_v40 = vld [vmem:[%s799_s4] ss:$0 sm:$0xff] (!%p192_p9)  ;;  %s218_s25 = scalar_lea.vmem (!%p192_p9), [#allocation2], %s453_s15 }
  0x12   : > { %501 = vmatprep.subr.bf16.mxu0 (!%p192_p9), %v500_v5  ;;  %s387_s26 = sshll.u32 (!%p192_p9), %s218_s25, 4  ;;  %s751_s26 = int_to_ptr.vmem [resolvable:$true] %s387_s26 }
  0x15   : > { %s808_s11 = smov (!%p220_p10, %s454_s11), 3  ;;  %503 = vmatpush3.bf16.msra.mxu0 %v500_v5 }
  0x16   : > { %s455_s23 = sshll.u32 %s808_s11, 3  ;;  %505 = vmatprep.subr.bf16.mxu0 %v504_v8 }
  0x17   : > { %s223_s9 = scalar_lea.vmem %s795_s0, %s455_s23  ;;  %s466_s23 = sshll.u32 %s675_s22, 8 }
  0x18   : > { %v226_v11 = vld [vmem:[%s223_s9] sm:$0xff]  ;;  %v227_v13 = vld [vmem:[%s223_s9 + $0x8] sm:$0xff]  ;;  %s749_s7 = scalar_lea.hbm %s800_s5, %s466_s23  ;;  %s557_s22 = scalar_lea.vmem %s751_s26, 256 }
  0x19   : > { %493 = vmatprep.mubr.msk.f32.mxu0 %vm243_vm0, %v226_v11  ;;  %507 = vmatpush3.bf16.msra.mxu0 %v504_v8  ;;  %p558_p11 = scmp.ne.s32.totalorder %s751_s26, %s557_s22  ;;  %s621_s9 = smov [#allocation2]  }
  0x1a   : > { %509 = vmatprep.subr.bf16.mxu0 %v508_v12  ;;  %s561_s10 = sshll.u32 %s621_s9, 4  ;;  %s562_s10 = int_to_ptr.vmem [resolvable:$false] %s561_s10 }
  0x1b   : > { %p559_p12 = pnand %p558_p11, %p692_p5  ;;  %s563_s11 = scalar_lea.vmem %s562_s10, 512 }
  0x1c   : > { %p564_p0 = scmp.lt.s32.totalorder %s751_s26, %s562_s10  ;;  %p565_p1 = scmp.lt.s32.totalorder %s563_s11, %s557_s22 }
  0x1d   : > { %511 = vmatpush3.bf16.msra.mxu0 %v508_v12  ;;  %p560_p13 = pneg %p559_p12 }
  0x1e   : > { %p566_p2 = por %p565_p1, %p564_p0 }
  0x20   : > { %494 = vmatmul.mubr.msk.f32.vlgmr.msra.gmra.mrb[0].mxu0 %vm243_vm0, %v227_v13  ;;  %p567_p3 = pnand %p566_p2, %p560_p13 }
  0xf3   : > { %v495_v15 = vpop.f32.mrb[0].mxu0 }
  0xf4   : > { %v316_v16 = vpop.f32.mrb[1].mxu0  ;;  %v322_v18 = vadd.f32 %v495_v15, %v456_v14 }
  0xf5   : > { %v317_v17 = vadd.f32 %v456_v14, %v316_v16 }
  0xf6   : > { %v329_v20 = vsel %vm325_vm1, %v322_v18, 0.0 }
  0xf7   : > { %v326_v19 = vsel %vm325_vm1, %v317_v17, 0.0 }
  0xf8   : > { %327 = vadd.xlane.f32.xlu0 %v326_v19 }
  0xfc   : > { %330 = vadd.xlane.f32.xlu0 %v329_v20 }
 0x185   : > { %v328_v21 = vpop.xlane.xlu0 %327 }
 0x186   : > { %v333_v22 = vmul.f32 0.010416667, %v328_v21 }
 0x188   : > { %v335_v23 = vsub.f32 %v317_v17, %v333_v22 }
 0x189   : > { %v331_v24 = vpop.xlane.xlu0 %330 }
 0x18a   : > { %v334_v25 = vmul.f32 0.010416667, %v331_v24  ;;  %v337_v26 = vmul.f32 %v335_v23, %v335_v23 }
 0x18c   : > { %v336_v27 = vsub.f32 %v322_v18, %v334_v25  ;;  %v339_v28 = vsel %vm325_vm1, %v337_v26, 0.0 }
 0x18d   : > { %340 = vadd.xlane.f32.xlu1 %v339_v28 }
 0x18e   : > { %v338_v29 = vmul.f32 %v336_v27, %v336_v27 }
 0x190   : > { %v342_v30 = vsel %vm325_vm1, %v338_v29, 0.0 }
 0x191   : > { %343 = vadd.xlane.f32.xlu1 %v342_v30 }
 0x21a   : > { %v341_v31 = vpop.xlane.xlu1 %340 }
 0x21b   : > { %v345_v32 = vmul.f32 0.010416667, %v341_v31 }
 0x21d   : > { %v347_v33 = vadd.f32 1e-05, %v345_v32 }
 0x21e   : > { %v344_v34 = vpop.xlane.xlu1 %343 }
 0x21f   : > { %553 = vrsqrt.f32 %v347_v33  ;;  %v346_v35 = vmul.f32 0.010416667, %v344_v34 }
 0x221   : > { %v348_v36 = vadd.f32 1e-05, %v346_v35 }
 0x223   : > { %555 = vrsqrt.f32 %v348_v36 }
 0x229   : > { %v554_v37 = vpop.eup %553 }
 0x22a   : > { %v351_v39 = vmul.f32 %v554_v37, %v335_v23 }
 0x22c   : > { %v360_v41 = vmul.f32 %v459_v38, %v351_v39 }
 0x22d   : > { %v556_v42 = vpop.eup %555 }
 0x22e   : > { %v352_v43 = vmul.f32 %v556_v42, %v336_v27  ;;  %v369_v44 = vadd.f32 %v460_v40, %v360_v41 }
 0x230   : > { %v361_v45 = vmul.f32 %v459_v38, %v352_v43  ;;  %371 = vst.msk [vmem:[%s218_s25] sm:$0xff] %vm325_vm1, %v369_v44 }
 0x232   : > { %v370_v46 = vadd.f32 %v460_v40, %v361_v45 }
 0x234   : > { %372 = vst.msk [vmem:[%s218_s25 + $0x8] sm:$0xff] %vm325_vm1, %v370_v46 }
 0x235   : > { %570 = shalt.err (!%p567_p3)
}
 0x236   : > { %s571_s12 = scalar_lea.hbm %s749_s7, 256  ;;  %s575_s15 = scalar_lea.hbm %s800_s5, 512 }
 0x237   : > { %p572_p4 = scmp.ne.s32.totalorder %s749_s7, %s571_s12  ;;  %p576_p9 = scmp.lt.u32.totalorder %s749_s7, %s800_s5 }
 0x238   : > { %p577_p10 = scmp.lt.u32.totalorder %s575_s15, %s571_s12  ;;  %p579_p12 = scmp.lt.u32.totalorder %s571_s12, %s749_s7 }
 0x239   : > { %p573_p7 = pnand %p572_p4, %p692_p5 }
 0x23a   : > { %p578_p11 = por %p577_p10, %p576_p9 }
 0x23b   : > { %p574_p8 = pneg %p573_p7 }
 0x23c   : > { %p580_p13 = por %p579_p12, %p578_p11 }
 0x23e   : > { %p581_p0 = pnand %p580_p13, %p574_p8 }
 0x240   : > { %584 = shalt.err (!%p581_p0)
}
 0x241   : > { %s622_s23 = smov 128   ;;  %s623_s25 = smov 8  }
 0x242   : > { %512 = dma.vmem_to_hbm [thread:$0]  (%p692_p5), %s751_s26, 256, %s749_s7, %s754_s8, %s622_s23, %s622_s23, %s623_s25  }
 0x243 PF: > { %p518_p1 = scmp.ge.s32.totalorder %s619_s21, 2  ;;  %s402_s30 = sand.u32 1, %s607_s18  }
 0x244   : > { %s403_s6 = scalar_lea.sflag [#allocation3], %s402_s30 }
 0x245   : > { %p515_p2 = pnand %p518_p1, %p696_p6 }
 0x247   : > { %602 = dma.done.wait (!%p515_p2), %s403_s6, 256  }
 0x248   : > { %604 = vsyncadd (!%p515_p2), %s403_s6, 4294967040  ;;  %p15_p3 = scmp.ge.s32.totalorder %s679_s24, 4   ;;  %s803_s18 = smov %s611_s19 }
 0x249   : > { %s804_s19 = smov %s615_s20  ;;  %s805_s20 = smov %s690_s27 }
 0x24a   : > { %s806_s21 = smov %s679_s24  ;;  %17 = sbr.rel (!%p15_p3) target bundleno = 3 (0x3), region = 75 }
 0x251   :  { %408 = vsyncpa [#allocation3], 1 }
 0x252   :  { %410 = vsyncpa [#allocation3 + $0x1], 1 }

</bundles_post_ra>
